<compile_context>
chip_gen: v6e
topology: v6e:2x2x1
jax: 0.10.0
libtpu: 0.0.40
codegen_flags: <defaults>
</compile_context>

<pallas_src>
import functools
import math

import jax
import jax.numpy as jnp
from jax import lax
from jax.experimental import pallas as pl
from jax.experimental.pallas import tpu as pltpu


def _round_up(x, m):
    return (x + m - 1) // m * m


# ---------------------------------------------------------------------------
# Path A: small table resident in VMEM, gather via one-hot matmul on the MXU.
# ---------------------------------------------------------------------------
def _resident_kernel(ids_ref, table_ref, o_ref, *, scale):
    # ids_ref:   (tm, 1) int32 token ids for this tile (VMEM)
    # table_ref: (vocab, d_model) embedding table, resident in VMEM
    # o_ref:     (tm, d_model) output tile
    ids = ids_ref[...]                                        # (tm, 1) int32
    tm = ids.shape[0]
    vocab = table_ref.shape[0]
    onehot = ids == lax.broadcasted_iota(jnp.int32, (tm, vocab), 1)
    rows = jnp.dot(onehot.astype(table_ref.dtype), table_ref[...],
                   preferred_element_type=jnp.float32)        # (tm, d_model) f32
    o_ref[...] = (rows * scale).astype(o_ref.dtype)


def _embeddings_resident(ids_flat, table, tm, out_dtype, vmem_limit):
    vocab, d_model = table.shape
    n = ids_flat.shape[0]
    n_pad = _round_up(n, tm)
    if n_pad != n:
        ids_flat = jnp.pad(ids_flat, (0, n_pad - n))
    ids2d = ids_flat.reshape(n_pad, 1)

    kernel = functools.partial(_resident_kernel, scale=math.sqrt(d_model))
    out = pl.pallas_call(
        kernel,
        out_shape=jax.ShapeDtypeStruct((n_pad, d_model), out_dtype),
        grid_spec=pltpu.PrefetchScalarGridSpec(
            num_scalar_prefetch=0,
            grid=(n_pad // tm,),
            in_specs=[
                pl.BlockSpec((tm, 1), lambda i: (i, 0)),           # ids tile
                pl.BlockSpec((vocab, d_model), lambda i: (0, 0)),  # resident table
            ],
            out_specs=pl.BlockSpec((tm, d_model), lambda i: (i, 0)),
        ),
        compiler_params=pltpu.CompilerParams(
            dimension_semantics=("parallel",),
            vmem_limit_bytes=vmem_limit,
        ),
    )(ids2d, table)
    return out[:n] if n_pad != n else out


# ---------------------------------------------------------------------------
# Path B: table in HBM, per-row DMA gather with cross-step prefetch.
# ---------------------------------------------------------------------------
def _gather_kernel(ids_ref, table_hbm, o_ref, row_buf, sems, *, tm, scale):
    # ids_ref:   (n_pad,) int32 token ids in SMEM (scalar prefetch)
    # table_hbm: (vocab, d_model) embedding table in HBM (pl.ANY)
    # o_ref:     (tm, d_model) output tile in VMEM
    # row_buf:   (2, tm, d_model) VMEM double buffer for gathered rows
    # sems:      (2,) DMA semaphores, one per buffer slot
    i = pl.program_id(0)
    nsteps = pl.num_programs(0)
    slot = i & 1
    next_slot = 1 - slot

    def issue_tile(step, dst_slot):
        base = step * tm

        def body(t, carry):
            tok = ids_ref[base + t]
            pltpu.make_async_copy(
                table_hbm.at[pl.ds(tok, 1), :],
                row_buf.at[dst_slot, pl.ds(t, 1), :],
                sems.at[dst_slot],
            ).start()
            return carry

        # Unrolled so several DMA descriptors are emitted per loop iteration.
        lax.fori_loop(0, tm, body, 0, unroll=8)

    # Prime slot 0 on the first grid step.
    @pl.when(i == 0)
    def _():
        issue_tile(0, 0)

    # Prefetch the next tile's rows into the other slot; this overlaps with
    # the wait + scale/store below and with the output writeback pipeline.
    @pl.when(i + 1 < nsteps)
    def _():
        issue_tile(i + 1, next_slot)

    # Single aggregated wait: the tm row copies exactly fill row_buf[slot],
    # so waiting on the whole slot consumes exactly the signaled amount.
    pltpu.make_async_copy(row_buf.at[slot], row_buf.at[slot], sems.at[slot]).wait()

    # Scale in the table dtype (bf16 stays bf16 on v6e/v7x), lane-dense store.
    rows = row_buf[slot]
    o_ref[...] = (rows * jnp.asarray(scale, dtype=rows.dtype)).astype(o_ref.dtype)


def _embeddings_gather(ids_flat, table, tm, out_dtype, vmem_limit):
    vocab, d_model = table.shape
    n = ids_flat.shape[0]
    n_pad = _round_up(n, tm)
    if n_pad != n:
        # Padded tail gathers row 0 and is sliced off host-side (wasted HBM
        # traffic only on the final tile).
        ids_flat = jnp.pad(ids_flat, (0, n_pad - n))

    kernel = functools.partial(_gather_kernel, tm=tm, scale=math.sqrt(d_model))
    out = pl.pallas_call(
        kernel,
        out_shape=jax.ShapeDtypeStruct((n_pad, d_model), out_dtype),
        grid_spec=pltpu.PrefetchScalarGridSpec(
            num_scalar_prefetch=1,                        # token ids -> SMEM
            grid=(n_pad // tm,),
            in_specs=[pl.BlockSpec(memory_space=pl.ANY)],  # table stays in HBM
            out_specs=pl.BlockSpec((tm, d_model), lambda i, ids: (i, 0)),
            scratch_shapes=[
                pltpu.VMEM((2, tm, d_model), table.dtype),   # double-buffered rows
                pltpu.SemaphoreType.DMA((2,)),               # one sem per slot
            ],
        ),
        compiler_params=pltpu.CompilerParams(
            # "arbitrary": the cross-step prefetch chain carries state
            # (slot parity + semaphores) across grid iterations.
            dimension_semantics=("arbitrary",),
            vmem_limit_bytes=vmem_limit,
        ),
    )(ids_flat, table)
    return out[:n] if n_pad != n else out


# ---------------------------------------------------------------------------
# Public wrapper.
# ---------------------------------------------------------------------------
def embeddings_forward(token_ids, table, *, tm=256, gather_from_hbm=None):
    """token_ids: integer ids of any shape; table: (vocab, d_model).

    Returns token_ids.shape + (d_model,) = table[token_ids] * sqrt(d_model),
    in the table's dtype (matching nn.Embedding weight dtype).

    Best performance when d_model is a multiple of 128 (lane-dense stores);
    smaller d_model still works but hits masked-store / lane-padding costs.
    """
    orig_shape = tuple(token_ids.shape)
    vocab, d_model = table.shape
    n_tok = 1
    for s in orig_shape:
        n_tok *= s
    ids_flat = token_ids.reshape(n_tok).astype(jnp.int32)

    itemsize = jnp.dtype(table.dtype).itemsize
    # Sublane pack alignment: 8 for f32, 16 for bf16, 32 for int8.
    align = max(8, 32 // max(1, itemsize))
    # Token tile: large enough to amortize the ~0.35 us/step overhead, aligned,
    # but never larger than the (aligned) token count.
    tm = max(align, min(_round_up(tm, align), _round_up(n_tok, align)))

    table_bytes = vocab * d_model * itemsize
    if gather_from_hbm is None:
        gather_from_hbm = not (table_bytes <= 8 * 1024 * 1024 and vocab <= 4096)

    if gather_from_hbm:
        # Keep 2x row_buf + 2x pipelined output tile under ~40 MiB so the
        # kernel fits v7x's 64 MiB VMEM with headroom.
        per_token_bytes = d_model * (2 * itemsize + 2 * itemsize)
        while tm > align and tm * per_token_bytes > 40 * 1024 * 1024:
            tm //= 2
        tm = max(align, (tm // align) * align)
        need = tm * per_token_bytes + (1 << 20)
        vmem_limit = int(min(64 * 1024 * 1024, max(32 * 1024 * 1024, 2 * need)))
        out2d = _embeddings_gather(ids_flat, table, tm, table.dtype, vmem_limit)
    else:
        need = table_bytes + 2 * tm * d_model * itemsize + tm * vocab * 4
        vmem_limit = int(min(64 * 1024 * 1024, max(32 * 1024 * 1024, 2 * need)))
        out2d = _embeddings_resident(ids_flat, table, tm, table.dtype, vmem_limit)

    return out2d.reshape(*orig_shape, d_model)


if __name__ == "__main__":
    d_model, vocab = 32, 128

    key = jax.random.PRNGKey(0)
    kw, ki, ki2 = jax.random.split(key, 3)

    # nn.Embedding weight ~ N(0, 1)
    table = jax.random.normal(kw, (vocab, d_model), jnp.float32)
    scale = math.sqrt(d_model)

    # Case 1: small-table VMEM-resident path, batch=2, seq=8.
    ids = jax.random.randint(ki, (2, 8), 0, vocab, dtype=jnp.int32)
    out = jax.block_until_ready(embeddings_forward(ids, table))
    ref = table[ids] * scale
    assert out.shape == (2, 8, d_model)
    assert jnp.allclose(out, ref, atol=1e-5, rtol=1e-5)

    # Case 2: resident path with padding / multiple grid steps (batch=2, seq=12).
    ids2 = jax.random.randint(ki2, (2, 12), 0, vocab, dtype=jnp.int32)
    out2 = jax.block_until_ready(embeddings_forward(ids2, table, tm=16))
    ref2 = table[ids2] * scale
    assert out2.shape == (2, 12, d_model)
    assert jnp.allclose(out2, ref2, atol=1e-5, rtol=1e-5)

    # Case 3: force the HBM gather path (used for production vocab sizes);
    # tm=8 -> 3 grid steps, exercising priming, cross-step prefetch and the
    # double-buffered slots.
    out3 = jax.block_until_ready(
        embeddings_forward(ids2, table, tm=8, gather_from_hbm=True))
    assert out3.shape == (2, 12, d_model)
    assert jnp.allclose(out3, ref2, atol=1e-5, rtol=1e-5)

    print("KERNEL_OK")
</pallas_src>

<mosaic_0001>
module attributes {stable_mosaic.version = 11 : i64} {
  func.func @_resident_kernel(%arg0: i32, %arg1: memref<16x1xi32, #tpu.memory_space<vmem>>, %arg2: memref<128x32xf32, #tpu.memory_space<vmem>>, %arg3: memref<16x32xf32, #tpu.memory_space<vmem>>) attributes {dimension_semantics = [#tpu.dimension_semantics<parallel>], iteration_bounds = array<i64: 1>, scalar_prefetch = 0 : i64, scratch_operands = 0 : i64, tpu.core_type = #tpu.core_type<tc>, window_params = [{transform_indices = @transform_0, window_bounds = array<i64: 16, 1>}, {pipeline_mode = #tpu.pipeline_mode<synchronous>, transform_indices = @transform_1, window_bounds = array<i64: 128, 32>}, {transform_indices = @transform_2, window_bounds = array<i64: 16, 32>}]} {
    %c0 = arith.constant 0 : index
    %c0_0 = arith.constant 0 : index
    %0 = vector.load %arg1[%c0, %c0_0] : memref<16x1xi32, #tpu.memory_space<vmem>>, vector<16x1xi32>
    %1 = tpu.iota {dimensions = array<i32: 1>} : vector<16x128xi32>
    %2 = vector.broadcast %0 : vector<16x1xi32> to vector<16x128xi32>
    %3 = arith.cmpi eq, %2, %1 : vector<16x128xi32>
    %4 = arith.extui %3 : vector<16x128xi1> to vector<16x128xi32>
    %5 = arith.sitofp %4 : vector<16x128xi32> to vector<16x128xf32>
    %c0_1 = arith.constant 0 : index
    %c0_2 = arith.constant 0 : index
    %6 = vector.load %arg2[%c0_1, %c0_2] : memref<128x32xf32, #tpu.memory_space<vmem>>, vector<128x32xf32>
    %cst = arith.constant dense<0.000000e+00> : vector<16x32xf32>
    %7 = tpu.matmul %5, %6, %cst {dimension_numbers = #tpu.dot_dimension_numbers<[1], [0], [0], [1], [0, 0, 1, 1], [], []>} : vector<16x128xf32>, vector<128x32xf32>, vector<16x32xf32> -> vector<16x32xf32>
    %cst_3 = arith.constant 5.65685415 : f32
    %8 = vector.broadcast %cst_3 : f32 to vector<16x32xf32>
    %9 = arith.mulf %7, %8 : vector<16x32xf32>
    %c0_4 = arith.constant 0 : index
    %c0_5 = arith.constant 0 : index
    %10 = vector.load %arg3[%c0_4, %c0_5] : memref<16x32xf32, #tpu.memory_space<vmem>>, vector<16x32xf32>
    tpu.vector_store %arg3[%c0_4, %c0_5], %9 {strides = array<i32>} : memref<16x32xf32, #tpu.memory_space<vmem>>, vector<16x32xf32>,
    return
  }
  func.func @transform_0(%arg0: i32) -> (i32, i32) {
    %c0_i32 = arith.constant 0 : i32
    %c0_i32_0 = arith.constant 0 : i32
    return %arg0, %c0_i32 : i32, i32
  }
  func.func @transform_1(%arg0: i32) -> (i32, i32) {
    %c0_i32 = arith.constant 0 : i32
    %c0_i32_0 = arith.constant 0 : i32
    %c0_i32_1 = arith.constant 0 : i32
    return %c0_i32, %c0_i32_0 : i32, i32
  }
  func.func @transform_2(%arg0: i32) -> (i32, i32) {
    %c0_i32 = arith.constant 0 : i32
    %c0_i32_0 = arith.constant 0 : i32
    return %arg0, %c0_i32 : i32, i32
  }
}

</mosaic_0001>

<bundles_post_ra>
// kernel: tpu_custom_call.1
= control target key start
LH: loop header
LB: loop body
LE: loop exit
PB: predicated region body
PF: predicated region fallthrough
CT: control target
= control target key end

     0   :  { %v225_v2 = vmov 0   ;;  %s302_s0 = inlined_call_operand.vmem [shape: s32[16,1], index: 0, kind: input, shape index: {}]   ;;  %s303_s1 = inlined_call_operand.vmem [shape: f32[128,32], index: 1, kind: input, shape index: {}]   ;;  %s304_s2 = inlined_call_operand.hbm [shape: f32[16,32], index: 2, kind: output, shape index: {}]  }
   0x1   :  { %v12_v0 = vld [vmem:[%s302_s0] sm:$0xff]  ;;  %v43_v1 = vld [vmem:[%s303_s1 + $0x78] sm:$0xff]  ;;  %202 = vset.pattern.permute.xlu0 %v225_v2  ;;  %v42_v3 = vld [vmem:[%s303_s1 + $0x70] sm:$0xff] }
   0x2   :  { %162 = vmatprep.subr.mxu0 %v43_v1  ;;  %17 = vperm.xlu0 %202, %v12_v0   ;;  %v41_v4 = vld [vmem:[%s303_s1 + $0x68] sm:$0xff]  ;;  %v40_v6 = vld [vmem:[%s303_s1 + $0x60] sm:$0xff]  ;;  %v39_v7 = vld [vmem:[%s303_s1 + $0x58] sm:$0xff] }
   0x3   :  { %163 = vmatpush3.msra.mxu0 %v43_v1  ;;  %v13_v5 = vld [vmem:[%s302_s0 + $0x8] sm:$0xff] }
   0x4   :  { %164 = vmatprep.subr.mxu0 %v42_v3 }
   0x5   :  { %165 = vmatpush3.msra.mxu0 %v42_v3 }
   0x6   :  { %166 = vmatprep.subr.mxu0 %v41_v4  ;;  %20 = vperm.xlu0 %202, %v13_v5  }
   0x7   :  { %167 = vmatpush3.msra.mxu0 %v41_v4 }
   0x8   :  { %7 = vsyncpa [#allocation3], 0  ;;  %168 = vmatprep.subr.mxu0 %v40_v6  ;;  %v38_v8 = vld [vmem:[%s303_s1 + $0x50] sm:$0xff]  ;;  %v37_v9 = vld [vmem:[%s303_s1 + $0x48] sm:$0xff]  ;;  %v14_v19 = vlaneseq  ;;  %v226_v22 = vmov 1.0   ;;  %s227_s16 = smov [#allocation2]  }
   0x9   :  { %169 = vmatpush3.msra.mxu0 %v40_v6  ;;  %v36_v10 = vld [vmem:[%s303_s1 + $0x40] sm:$0xff]  ;;  %v35_v11 = vld [vmem:[%s303_s1 + $0x38] sm:$0xff]  ;;  %v34_v12 = vld [vmem:[%s303_s1 + $0x30] sm:$0xff]  ;;  %s129_s17 = sshll.u32 %s227_s16, 4  ;;  %vm121_vm2 = vcmask 261120   ;;  %s130_s17 = int_to_ptr.vmem [resolvable:$true] %s129_s17 }
   0xa   :  { %170 = vmatprep.subr.mxu0 %v39_v7  ;;  %v33_v13 = vld [vmem:[%s303_s1 + $0x28] sm:$0xff]  ;;  %v32_v14 = vld [vmem:[%s303_s1 + $0x20] sm:$0xff]  ;;  %v31_v15 = vld [vmem:[%s303_s1 + $0x18] sm:$0xff]  ;;  %v15_v20 = vand.u32 127, %v14_v19  ;;  %p208_p1 = scmp.lt.s32.totalorder %s130_s17, %s130_s17 }
   0xb   :  { %171 = vmatpush3.msra.mxu0 %v39_v7  ;;  %v30_v16 = vld [vmem:[%s303_s1 + $0x10] sm:$0xff]  ;;  %v29_v17 = vld [vmem:[%s303_s1 + $0x8] sm:$0xff]  ;;  %v28_v18 = vld [vmem:[%s303_s1] sm:$0xff]  ;;  %s203_s1 = scalar_lea.vmem %s130_s17, 256 }
   0xc   :  { %172 = vmatprep.subr.mxu0 %v38_v8  ;;  %p204_p0 = scmp.ne.s32.totalorder %s130_s17, %s203_s1  ;;  %p209_p2 = scmp.lt.s32.totalorder %s203_s1, %s203_s1 }
   0xd   :  { %173 = vmatpush3.msra.mxu0 %v38_v8 }
   0xe   :  { %174 = vmatprep.subr.mxu0 %v37_v9  ;;  %p210_p3 = por %p209_p2, %p208_p1 }
   0xf   :  { %175 = vmatpush3.msra.mxu0 %v37_v9 }
  0x10   :  { %176 = vmatprep.subr.mxu0 %v36_v10  ;;  %p211_p4 = pnand %p210_p3, %p204_p0 }
  0x11   :  { %177 = vmatpush3.msra.mxu0 %v36_v10 }
  0x12   :  { %178 = vmatprep.subr.mxu0 %v35_v11 }
  0x13   :  { %179 = vmatpush3.msra.mxu0 %v35_v11 }
  0x14   :  { %180 = vmatprep.subr.mxu0 %v34_v12 }
  0x15   :  { %181 = vmatpush3.msra.mxu0 %v34_v12 }
  0x16   :  { %182 = vmatprep.subr.mxu0 %v33_v13 }
  0x17   :  { %183 = vmatpush3.msra.mxu0 %v33_v13 }
  0x18   :  { %184 = vmatprep.subr.mxu0 %v32_v14 }
  0x19   :  { %185 = vmatpush3.msra.mxu0 %v32_v14 }
  0x1a   :  { %186 = vmatprep.subr.mxu0 %v31_v15 }
  0x1b   :  { %187 = vmatpush3.msra.mxu0 %v31_v15 }
  0x1c   :  { %188 = vmatprep.subr.mxu0 %v30_v16 }
  0x1d   :  { %189 = vmatpush3.msra.mxu0 %v30_v16 }
  0x1e   :  { %190 = vmatprep.subr.mxu0 %v29_v17 }
  0x1f   :  { %191 = vmatpush3.msra.mxu0 %v29_v17 }
  0x20   :  { %192 = vmatprep.subr.mxu0 %v28_v18 }
  0x21   :  { %193 = vmatpush3.msra.mxu0 %v28_v18 }
  0x7d   :  { %v18_v21 = vpop.permute.xlu0 %17 }
  0x7e   :  { %vm22_vm0 = vcmp.eq.s32.totalorder %v18_v21, %v15_v20 }
  0x7f   :  { %194 = vmatprep.mubr.msk.f32.mxu0 %vm22_vm0, %v226_v22 }
  0x81   :  { %v21_v23 = vpop.permute.xlu0 %20 }
  0x82   :  { %vm23_vm1 = vcmp.eq.s32.totalorder %v21_v23, %v15_v20 }
  0x83   :  { %195 = vmatmul.mubr.msk.f32.vlgmr.msra.gmra.mxu0 %vm23_vm1, %v226_v22 }
 0x143   :  { %v196_v24 = vpop.f32.mrf.mxu0 }
 0x144   :  { %v120_v25 = vmul.f32 5.656854, %v196_v24 }
 0x145   :  { %v110_v26 = vpop.f32.mrf.mxu0 }
 0x146   :  { %123 = vst.msk [vmem:[#allocation2 + $0x8] sm:$0xff] %vm121_vm2, %v120_v25  ;;  %v119_v27 = vmul.f32 5.656854, %v110_v26 }
 0x148   :  { %122 = vst.msk [vmem:[#allocation2] sm:$0xff] %vm121_vm2, %v119_v27 }
 0x149   :  { %214 = shalt.err (!%p211_p4)
}
 0x14a   :  { %s228_s18 = smov 128   ;;  %s229_s19 = smov 8  }
 0x14b   :  { %135 = dma.vmem_to_hbm [thread:$0]  %s130_s17, 256, %s304_s2, [#allocation3], %s228_s18, %s228_s18, %s229_s19  }
 0x14c   :  { %223 = dma.done.wait [#allocation3], 256  }
 0x14d   :  { %224 = vsyncadd [#allocation3], 4294967040 }
 0x14e   :  { %139 = vsyncpa [#allocation3], 1 }

</bundles_post_ra>
